<compile_context>
chip_gen: v5e
topology: v5e:2x2
jax: 0.10.0
libtpu: 0.0.40
codegen_flags: <defaults>
</compile_context>

<pallas_src>
import functools

import jax
import jax.numpy as jnp
from jax.experimental import pallas as pl
from jax.experimental.pallas import tpu as pltpu


def _round_up(x, m):
    return ((x + m - 1) // m) * m


def _rel_kernel(alpha,
                boxes_ref, feats_ref,
                w1s_ref, w1_ref, w2_ref, b2_ref,
                out_ref):
    """boxes_ref: (T, 8)  [head cxcywh | tail cxcywh], f32
       feats_ref: (T, 2H) [head feats | tail feats], compute dtype
       w1s_ref:   (5, 2*out)    folded (emb @ w1_spatial + b1), sub|obj concat, f32
       w1_ref:    (2H, 2*out)   block-diag(sub_w1_feat, obj_w1_feat)
       w2_ref:    (2*out, 2*out) block-diag(sub_w2, obj_w2)
       b2_ref:    (1, 2*out)    f32
       out_ref:   (T, 2*out)    [sub_fc(head) | obj_fc(tail)], f32
    """
    f32 = jnp.float32
    b = boxes_ref[...]                                   # (T, 8), f32

    def to_xyxy_clamped(cx, cy, w, h):
        return (jnp.clip(cx - 0.5 * w, 0.0, 1.0),
                jnp.clip(cy - 0.5 * h, 0.0, 1.0),
                jnp.clip(cx + 0.5 * w, 0.0, 1.0),
                jnp.clip(cy + 0.5 * h, 0.0, 1.0))

    # box_cxcywh_to_xyxy(...).clamp(0, 1)
    h0, h1, h2, h3 = to_xyxy_clamped(b[:, 0:1], b[:, 1:2], b[:, 2:3], b[:, 3:4])
    t0, t1, t2, t3 = to_xyxy_clamped(b[:, 4:5], b[:, 5:6], b[:, 6:7], b[:, 7:8])

    # generate_spatial_relation (on the converted/clamped boxes, as in the
    # PyTorch forward which converts before calling it).
    above = h1 > t1 + alpha * t3
    below = h1 < t1 - alpha * t3
    between_y = (t1 - alpha * t3 < h1) & (h1 < t1 + alpha * t3)
    around = between_y & ((h0 < t0 - alpha * t2) | (h0 > t0 + alpha * t2))
    within = between_y & ((h0 > t0 - alpha * t2) & (h0 < t0 + alpha * t2))
    contain = (t2 * t3) < 1e-5

    rel = (above.astype(jnp.int32) * 1 + below.astype(jnp.int32) * 2
           + around.astype(jnp.int32) * 3 + within.astype(jnp.int32) * 4)
    rel = rel * (1 - contain.astype(jnp.int32))          # (T, 1), values 0..4

    rows = out_ref.shape[0]
    # one-hot (torch scatter_) as iota compare; embedding lookup (and b1) were
    # folded into w1s in the wrapper, so onehot @ w1s replaces
    # onehot @ emb @ w1s + b1.
    iota5 = jax.lax.broadcasted_iota(jnp.int32, (rows, 5), 1)
    onehot = (iota5 == rel).astype(w1s_ref.dtype)        # (T, 5), f32

    x = feats_ref[...]                                   # (T, 2H)
    hdn = (jnp.dot(x, w1_ref[...], preferred_element_type=f32)
           + jnp.dot(onehot, w1s_ref[...], preferred_element_type=f32))
    hdn = jnp.maximum(hdn, 0.0)                          # (T, 2*out)
    out = jnp.dot(hdn.astype(w2_ref.dtype), w2_ref[...],
                  preferred_element_type=f32) + b2_ref[...]
    out_ref[...] = jnp.maximum(out, 0.0).astype(out_ref.dtype)


def relation_feature_extractor(head_boxes, tail_boxes, head_feats, tail_feats,
                               params, *, alpha, tile_rows=512,
                               compute_dtype=jnp.float32):
    B, N, _ = head_boxes.shape
    H = head_feats.shape[-1]
    out_dim = params["sub_b2"].shape[-1]
    D2 = 2 * out_dim
    M = B * N

    f32 = jnp.float32
    # ---- fold / fuse weights (pure linear algebra, numerically identical) ----
    emb = params["emb"].astype(f32)
    b1_cat = jnp.concatenate([params["sub_b1"], params["obj_b1"]], axis=1)  # (1, 2*out)
    # onehot rows sum to exactly 1, so b1 can be folded into each w1s row.
    w1s_cat = jnp.concatenate([emb @ params["sub_w1s"],
                               emb @ params["obj_w1s"]], axis=1) + b1_cat   # (5, 2*out)
    zw1 = jnp.zeros((H, out_dim), f32)
    w1_blk = jnp.block([[params["sub_w1f"], zw1],
                        [zw1, params["obj_w1f"]]])                          # (2H, 2*out)
    zw2 = jnp.zeros((out_dim, out_dim), f32)
    w2_blk = jnp.block([[params["sub_w2"], zw2],
                        [zw2, params["obj_w2"]]])                           # (2*out, 2*out)
    b2_cat = jnp.concatenate([params["sub_b2"], params["obj_b2"]], axis=1)  # (1, 2*out)

    w1s_cat = w1s_cat.astype(f32)            # tiny table, keep full precision
    w1_blk = w1_blk.astype(compute_dtype)
    w2_blk = w2_blk.astype(compute_dtype)
    b2_cat = b2_cat.astype(f32)

    # ---- pack inputs: boxes (M, 8), feats (M, 2H) ----
    boxes = jnp.concatenate([head_boxes.reshape(M, 4),
                             tail_boxes.reshape(M, 4)], axis=1).astype(f32)
    feats = jnp.concatenate([head_feats.reshape(M, H),
                             tail_feats.reshape(M, H)], axis=1).astype(compute_dtype)

    # ---- pad rows so the grid covers M with full tiles ----
    tile_rows = _round_up(min(tile_rows, M), 8)
    M_pad = _round_up(M, tile_rows)
    if M_pad != M:
        boxes = jnp.pad(boxes, ((0, M_pad - M), (0, 0)))
        feats = jnp.pad(feats, ((0, M_pad - M), (0, 0)))

    grid = (M_pad // tile_rows,)
    row_spec = lambda last: pl.BlockSpec((tile_rows, last), lambda i: (i, 0))
    full_spec = lambda arr: pl.BlockSpec(arr.shape, lambda i: (0, 0))

    itemsize = jnp.dtype(compute_dtype).itemsize
    flops = int(2 * M_pad * (2 * H * D2 + 5 * D2 + D2 * D2))
    bytes_accessed = int(boxes.size * 4 + feats.size * itemsize
                         + M_pad * D2 * 4
                         + w1s_cat.size * 4
                         + (w1_blk.size + w2_blk.size) * itemsize
                         + b2_cat.size * 4)

    # NOTE: alpha is baked in via partial -> distinct alpha values recompile.
    out = pl.pallas_call(
        functools.partial(_rel_kernel, float(alpha)),
        grid=grid,
        in_specs=[row_spec(8), row_spec(2 * H),
                  full_spec(w1s_cat), full_spec(w1_blk),
                  full_spec(w2_blk), full_spec(b2_cat)],
        out_specs=row_spec(D2),
        out_shape=jax.ShapeDtypeStruct((M_pad, D2), f32),
        compiler_params=pltpu.CompilerParams(
            dimension_semantics=("parallel",)),
        cost_estimate=pl.CostEstimate(flops=flops, transcendentals=0,
                                      bytes_accessed=bytes_accessed),
    )(boxes, feats, w1s_cat, w1_blk, w2_blk, b2_cat)

    out = out[:M]                                        # drop padding rows
    hout = out[:, :out_dim].reshape(B, N, out_dim)
    tout = out[:, out_dim:].reshape(B, N, out_dim)
    return hout, tout


def init_params(key, hidden_dim, out_dim, semantic_dim=300):
    """Deterministic synthetic parameters matching the module's __init__ shapes."""
    ks = jax.random.split(key, 5)

    def kaiming_uniform(k, fan_in, fan_out, a=1.0):
        # torch kaiming_uniform_(weight(out,in), a) -> bound = gain*sqrt(3/fan_in)
        gain = (2.0 / (1.0 + a * a)) ** 0.5
        bound = gain * (3.0 ** 0.5) / (fan_in ** 0.5)
        # stored transposed: (in, out) so the kernel does x @ W
        return jax.random.uniform(k, (fan_in, fan_out), jnp.float32, -bound, bound)

    sub_dim = hidden_dim + semantic_dim
    emb = jax.random.normal(ks[0], (5, semantic_dim), jnp.float32)  # nn.Embedding default
    sub_w1 = kaiming_uniform(ks[1], sub_dim, out_dim)
    sub_w2 = kaiming_uniform(ks[2], out_dim, out_dim)
    obj_w1 = kaiming_uniform(ks[3], sub_dim, out_dim)
    obj_w2 = kaiming_uniform(ks[4], out_dim, out_dim)
    zb = jnp.zeros((1, out_dim), jnp.float32)  # constant_(bias, 0)
    return {
        "emb": emb,
        "sub_w1f": sub_w1[:hidden_dim], "sub_w1s": sub_w1[hidden_dim:],
        "sub_b1": zb, "sub_w2": sub_w2, "sub_b2": zb,
        "obj_w1f": obj_w1[:hidden_dim], "obj_w1s": obj_w1[hidden_dim:],
        "obj_b1": zb, "obj_w2": obj_w2, "obj_b2": zb,
    }


def _reference(hb, tb, hf, tf, params, alpha):
    """Pure-JAX reference mirroring the PyTorch forward."""
    def xyxy(b):
        cx, cy, w, h = jnp.split(b, 4, axis=-1)
        out = jnp.concatenate([cx - 0.5 * w, cy - 0.5 * h,
                               cx + 0.5 * w, cy + 0.5 * h], axis=-1)
        return jnp.clip(out, 0.0, 1.0)

    hb, tb = xyxy(hb), xyxy(tb)
    above = hb[..., 1] > tb[..., 1] + alpha * tb[..., 3]
    below = hb[..., 1] < tb[..., 1] - alpha * tb[..., 3]
    bet = (tb[..., 1] - alpha * tb[..., 3] < hb[..., 1]) & \
          (hb[..., 1] < tb[..., 1] + alpha * tb[..., 3])
    around = bet & ((hb[..., 0] < tb[..., 0] - alpha * tb[..., 2]) |
                    (hb[..., 0] > tb[..., 0] + alpha * tb[..., 2]))
    within = bet & ((hb[..., 0] > tb[..., 0] - alpha * tb[..., 2]) &
                    (hb[..., 0] < tb[..., 0] + alpha * tb[..., 2]))
    contain = tb[..., 2] * tb[..., 3] < 1e-5
    rel = (above * 1 + below * 2 + around * 3 + within * 4).astype(jnp.int32)
    rel = rel * (1 - contain.astype(jnp.int32))
    onehot = jax.nn.one_hot(rel, 5, dtype=jnp.float32)
    spat = onehot @ params["emb"]

    def mlp(x, w1f, w1s, b1, w2, b2):
        h = jnp.maximum(x @ w1f + spat @ w1s + b1[0], 0.0)
        return jnp.maximum(h @ w2 + b2[0], 0.0)

    return (mlp(hf, params["sub_w1f"], params["sub_w1s"], params["sub_b1"],
                params["sub_w2"], params["sub_b2"]),
            mlp(tf, params["obj_w1f"], params["obj_w1s"], params["obj_b1"],
                params["obj_w2"], params["obj_b2"]))


if __name__ == "__main__":
    B, N = 2, 8          # batch, num relation pairs per image
    hidden = 32          # args.hidden_dim
    out_dim = 64
    alpha = 0.5          # args.spatial_alpha

    key = jax.random.PRNGKey(0)
    kp, kb1, kb2, kf1, kf2 = jax.random.split(key, 5)
    params = init_params(kp, hidden, out_dim)

    head_boxes = jax.random.uniform(kb1, (B, N, 4), jnp.float32)   # cxcywh in [0,1]
    tail_boxes = jax.random.uniform(kb2, (B, N, 4), jnp.float32)
    head_feats = jax.random.normal(kf1, (B, N, hidden), jnp.float32)
    tail_feats = jax.random.normal(kf2, (B, N, hidden), jnp.float32)

    h_out, t_out = relation_feature_extractor(
        head_boxes, tail_boxes, head_feats, tail_feats, params, alpha=alpha)
    jax.block_until_ready((h_out, t_out))

    h_ref, t_ref = _reference(head_boxes, tail_boxes, head_feats, tail_feats,
                              params, alpha)
    assert h_out.shape == (B, N, out_dim) and t_out.shape == (B, N, out_dim)
    assert jnp.allclose(h_out, h_ref, atol=1e-4, rtol=1e-4)
    assert jnp.allclose(t_out, t_ref, atol=1e-4, rtol=1e-4)
    print("KERNEL_OK")
</pallas_src>

<mosaic_0001>
module attributes {stable_mosaic.version = 11 : i64} {
  func.func @_rel_kernel(%arg0: i32, %arg1: memref<16x8xf32, #tpu.memory_space<vmem>>, %arg2: memref<16x64xf32, #tpu.memory_space<vmem>>, %arg3: memref<5x128xf32, #tpu.memory_space<vmem>>, %arg4: memref<64x128xf32, #tpu.memory_space<vmem>>, %arg5: memref<128x128xf32, #tpu.memory_space<vmem>>, %arg6: memref<1x128xf32, #tpu.memory_space<vmem>>, %arg7: memref<16x128xf32, #tpu.memory_space<vmem>>) attributes {dimension_semantics = [#tpu.dimension_semantics<parallel>], iteration_bounds = array<i64: 1>, scalar_prefetch = 0 : i64, scratch_operands = 0 : i64, tpu.core_type = #tpu.core_type<tc>, window_params = [{transform_indices = @transform_0, window_bounds = array<i64: 16, 8>}, {transform_indices = @transform_1, window_bounds = array<i64: 16, 64>}, {pipeline_mode = #tpu.pipeline_mode<synchronous>, transform_indices = @transform_2, window_bounds = array<i64: 5, 128>}, {pipeline_mode = #tpu.pipeline_mode<synchronous>, transform_indices = @transform_3, window_bounds = array<i64: 64, 128>}, {pipeline_mode = #tpu.pipeline_mode<synchronous>, transform_indices = @transform_4, window_bounds = array<i64: 128, 128>}, {pipeline_mode = #tpu.pipeline_mode<synchronous>, transform_indices = @transform_5, window_bounds = array<i64: 1, 128>}, {transform_indices = @transform_6, window_bounds = array<i64: 16, 128>}]} {
    %c0 = arith.constant 0 : index
    %c0_0 = arith.constant 0 : index
    %0 = vector.load %arg1[%c0, %c0_0] : memref<16x8xf32, #tpu.memory_space<vmem>>, vector<16x8xf32>
    %1 = vector.extract_strided_slice %0 {offsets = [0, 0], sizes = [16, 1], strides = [1, 1]} : vector<16x8xf32> to vector<16x1xf32>
    %2 = vector.extract_strided_slice %0 {offsets = [0, 1], sizes = [16, 1], strides = [1, 1]} : vector<16x8xf32> to vector<16x1xf32>
    %3 = vector.extract_strided_slice %0 {offsets = [0, 2], sizes = [16, 1], strides = [1, 1]} : vector<16x8xf32> to vector<16x1xf32>
    %4 = vector.extract_strided_slice %0 {offsets = [0, 3], sizes = [16, 1], strides = [1, 1]} : vector<16x8xf32> to vector<16x1xf32>
    %cst = arith.constant 5.000000e-01 : f32
    %5 = vector.broadcast %cst : f32 to vector<16x1xf32>
    %6 = arith.mulf %5, %3 : vector<16x1xf32>
    %7 = arith.subf %1, %6 : vector<16x1xf32>
    %cst_1 = arith.constant 0.000000e+00 : f32
    %cst_2 = arith.constant 1.000000e+00 : f32
    %8 = vector.broadcast %cst_1 : f32 to vector<16x1xf32>
    %9 = arith.maximumf %8, %7 : vector<16x1xf32>
    %10 = vector.broadcast %cst_2 : f32 to vector<16x1xf32>
    %11 = arith.minimumf %10, %9 : vector<16x1xf32>
    %cst_3 = arith.constant 5.000000e-01 : f32
    %12 = vector.broadcast %cst_3 : f32 to vector<16x1xf32>
    %13 = arith.mulf %12, %4 : vector<16x1xf32>
    %14 = arith.subf %2, %13 : vector<16x1xf32>
    %cst_4 = arith.constant 0.000000e+00 : f32
    %cst_5 = arith.constant 1.000000e+00 : f32
    %15 = vector.broadcast %cst_4 : f32 to vector<16x1xf32>
    %16 = arith.maximumf %15, %14 : vector<16x1xf32>
    %17 = vector.broadcast %cst_5 : f32 to vector<16x1xf32>
    %18 = arith.minimumf %17, %16 : vector<16x1xf32>
    %19 = vector.extract_strided_slice %0 {offsets = [0, 4], sizes = [16, 1], strides = [1, 1]} : vector<16x8xf32> to vector<16x1xf32>
    %20 = vector.extract_strided_slice %0 {offsets = [0, 5], sizes = [16, 1], strides = [1, 1]} : vector<16x8xf32> to vector<16x1xf32>
    %21 = vector.extract_strided_slice %0 {offsets = [0, 6], sizes = [16, 1], strides = [1, 1]} : vector<16x8xf32> to vector<16x1xf32>
    %22 = vector.extract_strided_slice %0 {offsets = [0, 7], sizes = [16, 1], strides = [1, 1]} : vector<16x8xf32> to vector<16x1xf32>
    %cst_6 = arith.constant 5.000000e-01 : f32
    %23 = vector.broadcast %cst_6 : f32 to vector<16x1xf32>
    %24 = arith.mulf %23, %21 : vector<16x1xf32>
    %25 = arith.subf %19, %24 : vector<16x1xf32>
    %cst_7 = arith.constant 0.000000e+00 : f32
    %cst_8 = arith.constant 1.000000e+00 : f32
    %26 = vector.broadcast %cst_7 : f32 to vector<16x1xf32>
    %27 = arith.maximumf %26, %25 : vector<16x1xf32>
    %28 = vector.broadcast %cst_8 : f32 to vector<16x1xf32>
    %29 = arith.minimumf %28, %27 : vector<16x1xf32>
    %cst_9 = arith.constant 5.000000e-01 : f32
    %30 = vector.broadcast %cst_9 : f32 to vector<16x1xf32>
    %31 = arith.mulf %30, %22 : vector<16x1xf32>
    %32 = arith.subf %20, %31 : vector<16x1xf32>
    %cst_10 = arith.constant 0.000000e+00 : f32
    %cst_11 = arith.constant 1.000000e+00 : f32
    %33 = vector.broadcast %cst_10 : f32 to vector<16x1xf32>
    %34 = arith.maximumf %33, %32 : vector<16x1xf32>
    %35 = vector.broadcast %cst_11 : f32 to vector<16x1xf32>
    %36 = arith.minimumf %35, %34 : vector<16x1xf32>
    %cst_12 = arith.constant 5.000000e-01 : f32
    %37 = vector.broadcast %cst_12 : f32 to vector<16x1xf32>
    %38 = arith.mulf %37, %21 : vector<16x1xf32>
    %39 = arith.addf %19, %38 : vector<16x1xf32>
    %cst_13 = arith.constant 0.000000e+00 : f32
    %cst_14 = arith.constant 1.000000e+00 : f32
    %40 = vector.broadcast %cst_13 : f32 to vector<16x1xf32>
    %41 = arith.maximumf %40, %39 : vector<16x1xf32>
    %42 = vector.broadcast %cst_14 : f32 to vector<16x1xf32>
    %43 = arith.minimumf %42, %41 : vector<16x1xf32>
    %cst_15 = arith.constant 5.000000e-01 : f32
    %44 = vector.broadcast %cst_15 : f32 to vector<16x1xf32>
    %45 = arith.mulf %44, %22 : vector<16x1xf32>
    %46 = arith.addf %20, %45 : vector<16x1xf32>
    %cst_16 = arith.constant 0.000000e+00 : f32
    %cst_17 = arith.constant 1.000000e+00 : f32
    %47 = vector.broadcast %cst_16 : f32 to vector<16x1xf32>
    %48 = arith.maximumf %47, %46 : vector<16x1xf32>
    %49 = vector.broadcast %cst_17 : f32 to vector<16x1xf32>
    %50 = arith.minimumf %49, %48 : vector<16x1xf32>
    %cst_18 = arith.constant 5.000000e-01 : f32
    %51 = vector.broadcast %cst_18 : f32 to vector<16x1xf32>
    %52 = arith.mulf %51, %50 : vector<16x1xf32>
    %53 = arith.addf %36, %52 : vector<16x1xf32>
    %54 = arith.cmpf ogt, %18, %53 : vector<16x1xf32>
    %cst_19 = arith.constant 5.000000e-01 : f32
    %55 = vector.broadcast %cst_19 : f32 to vector<16x1xf32>
    %56 = arith.mulf %55, %50 : vector<16x1xf32>
    %57 = arith.subf %36, %56 : vector<16x1xf32>
    %58 = arith.cmpf olt, %18, %57 : vector<16x1xf32>
    %cst_20 = arith.constant 5.000000e-01 : f32
    %59 = vector.broadcast %cst_20 : f32 to vector<16x1xf32>
    %60 = arith.mulf %59, %50 : vector<16x1xf32>
    %61 = arith.subf %36, %60 : vector<16x1xf32>
    %62 = arith.cmpf olt, %61, %18 : vector<16x1xf32>
    %cst_21 = arith.constant 5.000000e-01 : f32
    %63 = vector.broadcast %cst_21 : f32 to vector<16x1xf32>
    %64 = arith.mulf %63, %50 : vector<16x1xf32>
    %65 = arith.addf %36, %64 : vector<16x1xf32>
    %66 = arith.cmpf olt, %18, %65 : vector<16x1xf32>
    %67 = arith.andi %62, %66 : vector<16x1xi1>
    %cst_22 = arith.constant 5.000000e-01 : f32
    %68 = vector.broadcast %cst_22 : f32 to vector<16x1xf32>
    %69 = arith.mulf %68, %43 : vector<16x1xf32>
    %70 = arith.subf %29, %69 : vector<16x1xf32>
    %71 = arith.cmpf olt, %11, %70 : vector<16x1xf32>
    %cst_23 = arith.constant 5.000000e-01 : f32
    %72 = vector.broadcast %cst_23 : f32 to vector<16x1xf32>
    %73 = arith.mulf %72, %43 : vector<16x1xf32>
    %74 = arith.addf %29, %73 : vector<16x1xf32>
    %75 = arith.cmpf ogt, %11, %74 : vector<16x1xf32>
    %76 = arith.ori %71, %75 : vector<16x1xi1>
    %77 = arith.andi %67, %76 : vector<16x1xi1>
    %cst_24 = arith.constant 5.000000e-01 : f32
    %78 = vector.broadcast %cst_24 : f32 to vector<16x1xf32>
    %79 = arith.mulf %78, %43 : vector<16x1xf32>
    %80 = arith.subf %29, %79 : vector<16x1xf32>
    %81 = arith.cmpf ogt, %11, %80 : vector<16x1xf32>
    %cst_25 = arith.constant 5.000000e-01 : f32
    %82 = vector.broadcast %cst_25 : f32 to vector<16x1xf32>
    %83 = arith.mulf %82, %43 : vector<16x1xf32>
    %84 = arith.addf %29, %83 : vector<16x1xf32>
    %85 = arith.cmpf olt, %11, %84 : vector<16x1xf32>
    %86 = arith.andi %81, %85 : vector<16x1xi1>
    %87 = arith.andi %67, %86 : vector<16x1xi1>
    %88 = arith.mulf %43, %50 : vector<16x1xf32>
    %cst_26 = arith.constant 9.99999974E-6 : f32
    %89 = vector.broadcast %cst_26 : f32 to vector<16x1xf32>
    %90 = arith.cmpf olt, %88, %89 : vector<16x1xf32>
    %91 = arith.extui %54 : vector<16x1xi1> to vector<16x1xi32>
    %c1_i32 = arith.constant 1 : i32
    %92 = vector.broadcast %c1_i32 : i32 to vector<16x1xi32>
    %93 = arith.muli %91, %92 : vector<16x1xi32>
    %94 = arith.extui %58 : vector<16x1xi1> to vector<16x1xi32>
    %c2_i32 = arith.constant 2 : i32
    %95 = vector.broadcast %c2_i32 : i32 to vector<16x1xi32>
    %96 = arith.muli %94, %95 : vector<16x1xi32>
    %97 = arith.addi %93, %96 : vector<16x1xi32>
    %98 = arith.extui %77 : vector<16x1xi1> to vector<16x1xi32>
    %c3_i32 = arith.constant 3 : i32
    %99 = vector.broadcast %c3_i32 : i32 to vector<16x1xi32>
    %100 = arith.muli %98, %99 : vector<16x1xi32>
    %101 = arith.addi %97, %100 : vector<16x1xi32>
    %102 = arith.extui %87 : vector<16x1xi1> to vector<16x1xi32>
    %c4_i32 = arith.constant 4 : i32
    %103 = vector.broadcast %c4_i32 : i32 to vector<16x1xi32>
    %104 = arith.muli %102, %103 : vector<16x1xi32>
    %105 = arith.addi %101, %104 : vector<16x1xi32>
    %106 = arith.extui %90 : vector<16x1xi1> to vector<16x1xi32>
    %c1_i32_27 = arith.constant 1 : i32
    %107 = vector.broadcast %c1_i32_27 : i32 to vector<16x1xi32>
    %108 = arith.subi %107, %106 : vector<16x1xi32>
    %109 = arith.muli %105, %108 : vector<16x1xi32>
    %110 = tpu.iota {dimensions = array<i32: 1>} : vector<16x5xi32>
    %111 = vector.broadcast %109 : vector<16x1xi32> to vector<16x5xi32>
    %112 = arith.cmpi eq, %110, %111 : vector<16x5xi32>
    %113 = arith.extui %112 : vector<16x5xi1> to vector<16x5xi32>
    %114 = arith.sitofp %113 : vector<16x5xi32> to vector<16x5xf32>
    %c0_28 = arith.constant 0 : index
    %c0_29 = arith.constant 0 : index
    %115 = vector.load %arg2[%c0_28, %c0_29] : memref<16x64xf32, #tpu.memory_space<vmem>>, vector<16x64xf32>
    %c0_30 = arith.constant 0 : index
    %c0_31 = arith.constant 0 : index
    %116 = vector.load %arg4[%c0_30, %c0_31] : memref<64x128xf32, #tpu.memory_space<vmem>>, vector<64x128xf32>
    %cst_32 = arith.constant dense<0.000000e+00> : vector<16x128xf32>
    %117 = tpu.matmul %115, %116, %cst_32 {dimension_numbers = #tpu.dot_dimension_numbers<[1], [0], [0], [1], [0, 0, 1, 1], [], []>} : vector<16x64xf32>, vector<64x128xf32>, vector<16x128xf32> -> vector<16x128xf32>
    %c0_33 = arith.constant 0 : index
    %c0_34 = arith.constant 0 : index
    %118 = vector.load %arg3[%c0_33, %c0_34] : memref<5x128xf32, #tpu.memory_space<vmem>>, vector<5x128xf32>
    %cst_35 = arith.constant dense<0.000000e+00> : vector<16x128xf32>
    %119 = tpu.matmul %114, %118, %cst_35 {dimension_numbers = #tpu.dot_dimension_numbers<[1], [0], [0], [1], [0, 0, 1, 1], [], []>} : vector<16x5xf32>, vector<5x128xf32>, vector<16x128xf32> -> vector<16x128xf32>
    %120 = arith.addf %117, %119 : vector<16x128xf32>
    %cst_36 = arith.constant 0.000000e+00 : f32
    %121 = vector.broadcast %cst_36 : f32 to vector<16x128xf32>
    %122 = arith.maximumf %120, %121 : vector<16x128xf32>
    %c0_37 = arith.constant 0 : index
    %c0_38 = arith.constant 0 : index
    %123 = vector.load %arg5[%c0_37, %c0_38] : memref<128x128xf32, #tpu.memory_space<vmem>>, vector<128x128xf32>
    %cst_39 = arith.constant dense<0.000000e+00> : vector<16x128xf32>
    %124 = tpu.matmul %122, %123, %cst_39 {dimension_numbers = #tpu.dot_dimension_numbers<[1], [0], [0], [1], [0, 0, 1, 1], [], []>} : vector<16x128xf32>, vector<128x128xf32>, vector<16x128xf32> -> vector<16x128xf32>
    %c0_40 = arith.constant 0 : index
    %c0_41 = arith.constant 0 : index
    %125 = vector.load %arg6[%c0_40, %c0_41] : memref<1x128xf32, #tpu.memory_space<vmem>>, vector<1x128xf32>
    %126 = vector.broadcast %125 : vector<1x128xf32> to vector<16x128xf32>
    %127 = arith.addf %124, %126 : vector<16x128xf32>
    %cst_42 = arith.constant 0.000000e+00 : f32
    %128 = vector.broadcast %cst_42 : f32 to vector<16x128xf32>
    %129 = arith.maximumf %127, %128 : vector<16x128xf32>
    %c0_43 = arith.constant 0 : index
    %c0_44 = arith.constant 0 : index
    %130 = vector.load %arg7[%c0_43, %c0_44] : memref<16x128xf32, #tpu.memory_space<vmem>>, vector<16x128xf32>
    tpu.vector_store %arg7[%c0_43, %c0_44], %129 {strides = array<i32>} : memref<16x128xf32, #tpu.memory_space<vmem>>, vector<16x128xf32>,
    return
  }
  func.func @transform_0(%arg0: i32) -> (i32, i32) {
    %c0_i32 = arith.constant 0 : i32
    %c0_i32_0 = arith.constant 0 : i32
    return %arg0, %c0_i32 : i32, i32
  }
  func.func @transform_1(%arg0: i32) -> (i32, i32) {
    %c0_i32 = arith.constant 0 : i32
    %c0_i32_0 = arith.constant 0 : i32
    return %arg0, %c0_i32 : i32, i32
  }
  func.func @transform_2(%arg0: i32) -> (i32, i32) {
    %c0_i32 = arith.constant 0 : i32
    %c0_i32_0 = arith.constant 0 : i32
    %c0_i32_1 = arith.constant 0 : i32
    return %c0_i32, %c0_i32_0 : i32, i32
  }
  func.func @transform_3(%arg0: i32) -> (i32, i32) {
    %c0_i32 = arith.constant 0 : i32
    %c0_i32_0 = arith.constant 0 : i32
    %c0_i32_1 = arith.constant 0 : i32
    return %c0_i32, %c0_i32_0 : i32, i32
  }
  func.func @transform_4(%arg0: i32) -> (i32, i32) {
    %c0_i32 = arith.constant 0 : i32
    %c0_i32_0 = arith.constant 0 : i32
    %c0_i32_1 = arith.constant 0 : i32
    return %c0_i32, %c0_i32_0 : i32, i32
  }
  func.func @transform_5(%arg0: i32) -> (i32, i32) {
    %c0_i32 = arith.constant 0 : i32
    %c0_i32_0 = arith.constant 0 : i32
    %c0_i32_1 = arith.constant 0 : i32
    return %c0_i32, %c0_i32_0 : i32, i32
  }
  func.func @transform_6(%arg0: i32) -> (i32, i32) {
    %c0_i32 = arith.constant 0 : i32
    %c0_i32_0 = arith.constant 0 : i32
    return %arg0, %c0_i32 : i32, i32
  }
}

</mosaic_0001>

<bundles_post_ra>
// kernel: tpu_custom_call.1
= control target key start
LH: loop header
LB: loop body
LE: loop exit
PB: predicated region body
PF: predicated region fallthrough
CT: control target
= control target key end

     0   :  { %11 = vsyncpa [#allocation3], 0  ;;  %s618_s0 = inlined_call_operand.vmem [shape: f32[16,8], index: 0, kind: input, shape index: {}]   ;;  %s619_s1 = inlined_call_operand.vmem [shape: f32[16,64], index: 1, kind: input, shape index: {}]   ;;  %s620_s2 = inlined_call_operand.vmem [shape: f32[5,128], index: 2, kind: input, shape index: {}]   ;;  %s621_s3 = inlined_call_operand.hbm [shape: f32[64,128], index: 3, kind: input, shape index: {}]   ;;  %s622_s4 = inlined_call_operand.hbm [shape: f32[128,128], index: 4, kind: input, shape index: {}]   ;;  %s623_s5 = inlined_call_operand.vmem [shape: f32[1,128], index: 5, kind: input, shape index: {}]   ;;  %s624_s6 = inlined_call_operand.hbm [shape: f32[16,128], index: 6, kind: output, shape index: {}]  }
   0x1   :  { %12 = vsyncpa [#allocation6], 0 }
   0x2   :  { %13 = vsyncpa [#allocation4], 0  ;;  %s24_s23 = sshll.u32 %s621_s3, 4  ;;  %s481_s24 = smov [#allocation2]   ;;  %s25_s23 = int_to_ptr.hbm [resolvable:$true] %s24_s23 }
   0x3   :  { %s26_s25 = sshll.u32 %s481_s24, 4  ;;  %s37_s28 = sshll.u32 %s622_s4, 4  ;;  %s27_s25 = int_to_ptr.vmem [resolvable:$true] %s26_s25  ;;  %s38_s28 = int_to_ptr.hbm [resolvable:$true] %s37_s28 }
   0x4   :  { %s482_s29 = smov 128   ;;  %s483_s30 = smov 8  }
   0x5   :  { %32 = dma.hbm_to_vmem [thread:$0]  %s25_s23, 1024, %s27_s25, [#allocation3], %s482_s29, %s482_s29, %s483_s30  }
   0x6   :  { %s484_s7 = smov [#allocation5]  }
   0x7   :  { %s39_s8 = sshll.u32 %s484_s7, 4  ;;  %s40_s8 = int_to_ptr.vmem [resolvable:$true] %s39_s8 }
   0x8   :  { %45 = dma.hbm_to_vmem [thread:$0]  %s38_s28, 2048, %s40_s8, [#allocation6], %s482_s29, %s482_s29, %s483_s30  }
   0x9   :  { %475 = dma.done.wait [#allocation3], 1024  }
   0xa   :  { %476 = vsyncadd [#allocation3], 4294966272 }
   0xb   :  { %477 = dma.done.wait [#allocation6], 2048  }
   0xc   :  { %478 = vsyncadd [#allocation6], 4294965248  ;;  %v56_v0 = vld [vmem:[%s618_s0] sm:$0xff]  ;;  %s485_s9 = smov 126   ;;  %v57_v2 = vld [vmem:[%s618_s0 + $0x8] sm:$0xff]  ;;  %s486_s12 = smov 4  }
   0xd   :  { %v58_v1 = vmul.f32 0.5, %v56_v0  ;;  %v59_v3 = vmul.f32 0.5, %v57_v2  ;;  %s487_s0 = smov 124   ;;  %v488_v26 = vmov 0   ;;  %s489_s13 = smov 127  }
   0xe   :  { %s490_s14 = smov 5   ;;  %s491_s15 = smov 125  }
   0xf   :  { %62 = vrot.lane.b32.xlu0 %v58_v1, %s485_s9  ;;  %s494_s22 = smov [#allocation7]   ;;  %s348_s26 = sshll.u32 %s624_s6, 4  ;;  %s349_s26 = int_to_ptr.hbm [resolvable:$true] %s348_s26 }
  0x10   :  { %s346_s23 = sshll.u32 %s494_s22, 4  ;;  %s347_s23 = int_to_ptr.vmem [resolvable:$true] %s346_s23 }
  0x17   :  { %64 = vrot.lane.b32.xlu0 %v59_v3, %s485_s9  ;;  %v492_v3 = vmov 1  }
  0x18   :  { %399 = vset.pattern.permute.xlu1 %v492_v3  ;;  %400 = vset.pattern.permute.xlu2 %v492_v3 }
  0x19   :  { %401 = vset.pattern.permute.xlu0 %v492_v3 }
  0x81   :  { %v63_v4 = vpop.permute.xlu0 %62 }
  0x82   :  { %v68_v5 = vsub.f32 %v56_v0, %v63_v4  ;;  %v74_v6 = vadd.f32 %v63_v4, %v56_v0  ;;  %v227_v4 = vld [vmem:[#allocation2 + $0x38] sm:$0xff] }
  0x83   :  { %278 = vmatpush.msra.mxu1 %v227_v4 }
  0x84   :  { %v70_v7 = vmax.f32 %v68_v5, 0.0  ;;  %v76_v8 = vmax.f32 %v74_v6, 0.0  ;;  %v226_v5 = vld [vmem:[#allocation2 + $0x30] sm:$0xff]  ;;  %v225_v6 = vld [vmem:[#allocation2 + $0x28] sm:$0xff] }
  0x85   :  { %279 = vmatpush.msra.mxu1 %v226_v5 }
  0x86   :  { %v72_v9 = vmin.f32 %v70_v7, 1.0  ;;  %v548_v10 = vmin.f32 %v76_v8, 1.0 }
  0x87   :  { %280 = vmatpush.msra.mxu1 %v225_v6 }
  0x88   :  { %108 = vrot.lane.b32.xlu0 %v72_v9, %s486_s12  ;;  %v80_v11 = vmul.f32 0.5, %v548_v10 }
  0x89   :  { %v65_v12 = vpop.permute.xlu0 %64 }
  0x8a   :  { %v69_v13 = vsub.f32 %v57_v2, %v65_v12  ;;  %v75_v14 = vadd.f32 %v65_v12, %v57_v2  ;;  %v82_v15 = vadd.f32 %v80_v11, %v72_v9  ;;  %v94_v21 = vsub.f32 %v72_v9, %v80_v11 }
  0x8c   :  { %v71_v16 = vmax.f32 %v69_v13, 0.0  ;;  %v77_v17 = vmax.f32 %v75_v14, 0.0  ;;  %86 = vrot.lane.b32.xlu1 %v82_v15, %s487_s0 }
  0x8e   :  { %v73_v18 = vmin.f32 %v71_v16, 1.0  ;;  %v553_v19 = vmin.f32 %v77_v17, 1.0 }
  0x90   :  { %v81_v20 = vmul.f32 0.5, %v553_v19 }
  0x92   :  { %v83_v22 = vadd.f32 %v81_v20, %v73_v18  ;;  %v558_v23 = vsub.f32 %v73_v18, %v81_v20  ;;  %v223_v20 = vld [vmem:[#allocation2 + $0x18] sm:$0xff] }
  0x94   :  { %98 = vrot.lane.b32.xlu1 %v94_v21, %s487_s0  ;;  %88 = vrot.lane.b32.xlu2 %v83_v22, %s487_s0  ;;  %v221_v22 = vld [vmem:[#allocation2 + $0x8] sm:$0xff] }
  0x9c   :  { %100 = vrot.lane.b32.xlu2 %v558_v23, %s487_s0 }
  0xee   :  { %v89_v24 = vpop.permute.xlu2 %88 }
  0xef   :  { %vm93_vm0 = vcmp.gt.f32.partialorder %v73_v18, %v89_v24  ;;  %vm117_vm9 = vcmp.lt.f32.partialorder %v73_v18, %v89_v24  ;;  %v220_v24 = vld [vmem:[#allocation2] sm:$0xff] }
  0xf0   :  { %v167_v29 = vsel %vm93_vm0, 1, %v488_v26  ;;  %v119_v41 = vsel %vm117_vm9, 1, %v488_v26 }
  0xf6   :  { %v101_v25 = vpop.permute.xlu2 %100 }
  0xf7   :  { %vm105_vm1 = vcmp.lt.f32.partialorder %v73_v18, %v101_v25  ;;  %vm141_vm10 = vcmp.gt.f32.partialorder %v73_v18, %v101_v25  ;;  %v218_v25 = vld [vmem:[%s619_s1] sm:$0xff] }
  0xf8   :  { %v169_v27 = vsel %vm105_vm1, 1, %v488_v26  ;;  %vm129_vm8 = vmor %vm105_vm1, %vm93_vm0 }
  0xf9   :  { %v171_v28 = vmul.u32 2, %v169_v27  ;;  %v131_v40 = vsel %vm129_vm8, 1, %v488_v26  ;;  %vm143_vm11 = vmand %vm141_vm10, %vm117_vm9  ;;  %v310_v27 = vld [vmem:[#allocation5 + $0x78] sm:$0xff] }
  0xfa   :  { %v145_v42 = vsel %vm143_vm11, 1, %v488_v26  ;;  %v109_v44 = vpop.permute.xlu0 %108  ;;  %315 = vmatpush.msra.mxu2 %v310_v27  ;;  %369 = vmatpush.msra.mxu3 %v310_v27 }
  0xfb   :  { %v566_v30 = vadd.s32 %v171_v28, %v167_v29  ;;  %vm114_vm12 = vcmp.lt.f32.partialorder %v94_v21, %v109_v44  ;;  %v222_v21 = vld [vmem:[#allocation2 + $0x10] sm:$0xff]  ;;  %v308_v29 = vld [vmem:[#allocation5 + $0x68] sm:$0xff] }
  0xfc   :  { %v309_v28 = vld [vmem:[#allocation5 + $0x70] sm:$0xff] }
  0xfd   :  { %316 = vmatpush.msra.mxu2 %v309_v28  ;;  %370 = vmatpush.msra.mxu3 %v309_v28 }
  0xfe   :  { %v87_v31 = vpop.permute.xlu1 %86 }
  0xff   :  { %vm116_vm2 = vcmp.lt.f32.partialorder %v72_v9, %v87_v31  ;;  %vm92_vm3 = vcmp.gt.f32.partialorder %v72_v9, %v87_v31  ;;  %317 = vmatpush.msra.mxu2 %v308_v29  ;;  %v306_v31 = vld [vmem:[#allocation5 + $0x58] sm:$0xff]  ;;  %371 = vmatpush.msra.mxu3 %v308_v29 }
 0x100   :  { %v118_v32 = vsel %vm116_vm2, 1, %v488_v26  ;;  %v166_v37 = vsel %vm92_vm3, 1, %v488_v26 }
 0x101   :  { %120 = vrot.lane.b32.xlu1 %v118_v32, %s486_s12  ;;  %v305_v32 = vld [vmem:[#allocation5 + $0x50] sm:$0xff] }
 0x106   :  { %v99_v33 = vpop.permute.xlu1 %98 }
 0x107   :  { %vm104_vm4 = vcmp.lt.f32.partialorder %v72_v9, %v99_v33  ;;  %vm140_vm5 = vcmp.gt.f32.partialorder %v72_v9, %v99_v33  ;;  %v304_v33 = vld [vmem:[#allocation5 + $0x48] sm:$0xff] }
 0x108   :  { %v168_v34 = vsel %vm104_vm4, 1, %v488_v26  ;;  %vm142_vm6 = vmand %vm140_vm5, %vm116_vm2 }
 0x109   :  { %v170_v35 = vmul.u32 2, %v168_v34  ;;  %156 = vrot.lane.b32.xlu1 %v548_v10, %s489_s13  ;;  %v144_v36 = vsel %vm142_vm6, 1, %v488_v26  ;;  %vm128_vm7 = vmor %vm104_vm4, %vm92_vm3  ;;  %v303_v34 = vld [vmem:[#allocation5 + $0x40] sm:$0xff] }
 0x10a   :  { %146 = vrot.lane.b32.xlu0 %v144_v36, %s490_s14  ;;  %v130_v38 = vsel %vm128_vm7, 1, %v488_v26  ;;  %v204_v36 = vlaneseq }
 0x10b   :  { %132 = vrot.lane.b32.xlu2 %v130_v38, %s490_s14  ;;  %v575_v39 = vadd.s32 %v170_v35, %v166_v37  ;;  %v302_v35 = vld [vmem:[#allocation5 + $0x38] sm:$0xff]  ;;  %v301_v37 = vld [vmem:[#allocation5 + $0x30] sm:$0xff]  ;;  %v300_v38 = vld [vmem:[#allocation5 + $0x28] sm:$0xff] }
 0x111   :  { %134 = vrot.lane.b32.xlu1 %v131_v40, %s490_s14  ;;  %v299_v40 = vld [vmem:[#allocation5 + $0x20] sm:$0xff] }
 0x112   :  { %122 = vrot.lane.b32.xlu0 %v119_v41, %s486_s12 }
 0x113   :  { %110 = vrot.lane.b32.xlu2 %v73_v18, %s486_s12 }
 0x11a   :  { %158 = vrot.lane.b32.xlu0 %v553_v19, %s489_s13 }
 0x11b   :  { %148 = vrot.lane.b32.xlu2 %v145_v42, %s490_s14  ;;  %v298_v42 = vld [vmem:[#allocation5 + $0x18] sm:$0xff] }
 0x165   :  { %v133_v43 = vpop.permute.xlu2 %132 }
 0x166   :  { %vm136_vm14 = vcmp.ne.s32.totalorder %v133_v43, 0  ;;  %v493_v43 = vmov 0.0  }
 0x16d   :  { %v111_v48 = vpop.permute.xlu2 %110 }
 0x16e   :  { %vm115_vm4 = vcmp.lt.f32.partialorder %v558_v23, %v111_v48  ;;  %v228_v23 = vld [vmem:[%s620_s2] sm:$0x1f]  ;;  %v296_v48 = vld [vmem:[#allocation5 + $0x8] sm:$0xff] }
 0x173   :  { %v121_v45 = vpop.permute.xlu1 %120 }
 0x174   :  { %vm124_vm13 = vcmp.ne.s32.totalorder %v121_v45, 0 }
 0x175   :  { %vm126_vm15 = vmand %vm114_vm12, %vm124_vm13  ;;  %v149_v57 = vpop.permute.xlu2 %148  ;;  %vm236_vm12 = vcmask 1044480   ;;  %vm263_vm13 = vcmask 523264  }
 0x176   :  { %vm138_vm0 = vmand %vm126_vm15, %vm136_vm14  ;;  %vm151_vm8 = vcmp.ne.s32.totalorder %v149_v57, 0  ;;  %364 = vmatpush.msk.msra.mxu0 %vm236_vm12, %v228_v23  ;;  %vm229_vm14 = vcmask 39936  }
 0x177   :  { %v174_v46 = vsel %vm138_vm0, 1, %v488_v26 }
 0x178   :  { %v176_v47 = vmul.u32 3, %v174_v46 }
 0x17a   :  { %178 = vrot.lane.b32.xlu1 %v176_v47, %s487_s0  ;;  %v297_v47 = vld [vmem:[#allocation5 + $0x10] sm:$0xff] }
 0x17b   :  { %v157_v49 = vpop.permute.xlu1 %156 }
 0x17c   :  { %v162_v50 = vmul.f32 %v157_v49, %v548_v10  ;;  %v147_v51 = vpop.permute.xlu0 %146  ;;  %v295_v49 = vld [vmem:[#allocation5] sm:$0xff] }
 0x17d   :  { %vm150_vm1 = vcmp.ne.s32.totalorder %v147_v51, 0 }
 0x17e   :  { %vm164_vm2 = vcmp.lt.f32.partialorder %v162_v50, 1e-05  ;;  %vm152_vm3 = vmand %vm126_vm15, %vm150_vm1 }
 0x17f   :  { %v194_v52 = vsel %vm164_vm2, 1, %v488_v26  ;;  %v184_v53 = vsel %vm152_vm3, 1, %v488_v26 }
 0x180   :  { %v196_v54 = vsub.s32 1, %v194_v52  ;;  %v186_v55 = vmul.u32 4, %v184_v53 }
 0x182   :  { %198 = vrot.lane.b32.xlu0 %v196_v54, %s491_s15  ;;  %188 = vrot.lane.b32.xlu2 %v186_v55, %s487_s0 }
 0x183   :  { %v135_v56 = vpop.permute.xlu1 %134 }
 0x184   :  { %v123_v58 = vpop.permute.xlu0 %122  ;;  %vm137_vm6 = vcmp.ne.s32.totalorder %v135_v56, 0 }
 0x185   :  { %vm125_vm5 = vcmp.ne.s32.totalorder %v123_v58, 0  ;;  %v402_v58 = vld [vmem:[%s623_s5] ss:$0 sm:$0xff] }
 0x186   :  { %vm127_vm7 = vmand %vm115_vm4, %vm125_vm5 }
 0x187   :  { %vm139_vm9 = vmand %vm127_vm7, %vm137_vm6 }
 0x188   :  { %vm153_vm10 = vmand %vm127_vm7, %vm151_vm8  ;;  %v175_v59 = vsel %vm139_vm9, 1, %v488_v26 }
 0x189   :  { %v177_v60 = vmul.u32 3, %v175_v59  ;;  %v185_v61 = vsel %vm153_vm10, 1, %v488_v26 }
 0x18a   :  { %v187_v62 = vmul.u32 4, %v185_v61 }
 0x18b   :  { %180 = vrot.lane.b32.xlu1 %v177_v60, %s487_s0 }
 0x18c   :  { %190 = vrot.lane.b32.xlu2 %v187_v62, %s487_s0  ;;  %v159_v63 = vpop.permute.xlu0 %158 }
 0x18d   :  { %v163_v0 = vmul.f32 %v159_v63, %v553_v19  ;;  %v224_v19 = vld [vmem:[#allocation2 + $0x20] sm:$0xff] }
 0x18e   :  { %281 = vmatpush.msra.mxu1 %v224_v19 }
 0x18f   :  { %vm165_vm11 = vcmp.lt.f32.partialorder %v163_v0, 1e-05 }
 0x190   :  { %v195_v1 = vsel %vm165_vm11, 1, %v488_v26  ;;  %282 = vmatpush.msra.mxu1 %v223_v20  ;;  %v219_v26 = vld [vmem:[%s619_s1 + $0x8] sm:$0xff] }
 0x191   :  { %v197_v2 = vsub.s32 1, %v195_v1 }
 0x192   :  { %283 = vmatpush.msra.mxu1 %v222_v21 }
 0x193   :  { %200 = vrot.lane.b32.xlu0 %v197_v2, %s491_s15 }
 0x194   :  { %284 = vmatpush.msra.mxu1 %v221_v22 }
 0x196   :  { %285 = vmatpush.msra.mxu1 %v220_v24 }
 0x197   :  { %367 = vmatmul.msk.f32.vlgmr.msra.gmra.mxu1 %vm263_vm13, %v218_v25 }
 0x19f   :  { %368 = vmatmul.msk.f32.gmra.mxu1 %vm263_vm13, %v219_v26 }
 0x1dc   :  { %v189_v9 = vpop.permute.xlu2 %188 }
 0x1e6   :  { %v191_v15 = vpop.permute.xlu2 %190 }
 0x1ec   :  { %v179_v7 = vpop.permute.xlu1 %178 }
 0x1ed   :  { %v182_v8 = vadd.s32 %v179_v7, %v575_v39  ;;  %v205_v39 = vand.u32 127, %v204_v36 }
 0x1ef   :  { %v192_v10 = vadd.s32 %v189_v9, %v182_v8 }
 0x1f4   :  { %v199_v11 = vpop.permute.xlu0 %198 }
 0x1f5   :  { %v202_v12 = vmul.u32 %v199_v11, %v192_v10 }
 0x1f7   :  { %207 = vperm.xlu1 %399, %v202_v12  }
 0x1fd   :  { %v181_v13 = vpop.permute.xlu1 %180 }
 0x1fe   :  { %v183_v14 = vadd.s32 %v181_v13, %v566_v30  ;;  %v307_v30 = vld [vmem:[#allocation5 + $0x60] sm:$0xff] }
 0x1ff   :  { %318 = vmatpush.msra.mxu2 %v307_v30  ;;  %372 = vmatpush.msra.mxu3 %v307_v30 }
 0x200   :  { %v193_v16 = vadd.s32 %v191_v15, %v183_v14 }
 0x201   :  { %319 = vmatpush.msra.mxu2 %v306_v31  ;;  %373 = vmatpush.msra.mxu3 %v306_v31 }
 0x203   :  { %320 = vmatpush.msra.mxu2 %v305_v32  ;;  %374 = vmatpush.msra.mxu3 %v305_v32 }
 0x205   :  { %v201_v17 = vpop.permute.xlu0 %200  ;;  %321 = vmatpush.msra.mxu2 %v304_v33  ;;  %375 = vmatpush.msra.mxu3 %v304_v33 }
 0x206   :  { %v203_v18 = vmul.u32 %v201_v17, %v193_v16 }
 0x207   :  { %322 = vmatpush.msra.mxu2 %v303_v34  ;;  %376 = vmatpush.msra.mxu3 %v303_v34 }
 0x208   :  { %210 = vperm.xlu2 %400, %v203_v18  }
 0x209   :  { %323 = vmatpush.msra.mxu2 %v302_v35  ;;  %377 = vmatpush.msra.mxu3 %v302_v35 }
 0x20b   :  { %324 = vmatpush.msra.mxu2 %v301_v37  ;;  %378 = vmatpush.msra.mxu3 %v301_v37 }
 0x20d   :  { %325 = vmatpush.msra.mxu2 %v300_v38  ;;  %379 = vmatpush.msra.mxu3 %v300_v38 }
 0x20f   :  { %326 = vmatpush.msra.mxu2 %v299_v40  ;;  %380 = vmatpush.msra.mxu3 %v299_v40 }
 0x211   :  { %327 = vmatpush.msra.mxu2 %v298_v42  ;;  %381 = vmatpush.msra.mxu3 %v298_v42 }
 0x213   :  { %328 = vmatpush.msra.mxu2 %v297_v47  ;;  %382 = vmatpush.msra.mxu3 %v297_v47 }
 0x214   :  { %v287_v50 = vpop.f32.mrf.mxu1 }
 0x215   :  { %329 = vmatpush.msra.mxu2 %v296_v48  ;;  %383 = vmatpush.msra.mxu3 %v296_v48 }
 0x217   :  { %330 = vmatpush.msra.mxu2 %v295_v49  ;;  %384 = vmatpush.msra.mxu3 %v295_v49 }
 0x21c   :  { %v290_v54 = vpop.f32.mrf.mxu1 }
 0x262   :  { %v211_v45 = vpop.permute.xlu2 %210 }
 0x263   :  { %vm213_vm0 = vcmp.eq.s32.totalorder %v205_v39, %v211_v45 }
 0x264   :  { %v363_v46 = vsel %vm213_vm0, 1.0, %v493_v43 }
 0x269   :  { %v208_v41 = vpop.permute.xlu1 %207 }
 0x26a   :  { %vm212_vm15 = vcmp.eq.s32.totalorder %v205_v39, %v208_v41 }
 0x26b   :  { %v362_v44 = vsel %vm212_vm15, 1.0, %v493_v43 }
 0x26c   :  { %365 = vmatmul.msk.f32.vlgmr.msra.gmra.mxu0 %vm229_vm14, %v362_v44 }
 0x274   :  { %366 = vmatmul.msk.f32.gmra.mxu0 %vm229_vm14, %v363_v46 }
 0x2e9   :  { %v257_v51 = vpop.f32.mrf.mxu0 }
 0x2ea   :  { %v288_v52 = vadd.f32 %v287_v50, %v257_v51 }
 0x2ec   :  { %v293_v53 = vmax.f32 %v288_v52, 0.0 }
 0x2ee   :  { %331 = vmatmul.f32.vlgmr.msra.gmra.mxu2 %v293_v53 }
 0x2f1   :  { %v260_v55 = vpop.f32.mrf.mxu0 }
 0x2f2   :  { %v291_v56 = vadd.f32 %v290_v54, %v260_v55 }
 0x2f4   :  { %v294_v57 = vmax.f32 %v291_v56, 0.0 }
 0x2f6   :  { %334 = vmatmul.f32.vlgmr.msra.gmra.mxu3 %v294_v57 }
 0x371   :  { %v332_v59 = vpop.f32.mrf.mxu2 }
 0x372   :  { %v333_v60 = vadd.f32 %v402_v58, %v332_v59 }
 0x374   :  { %v338_v61 = vmax.f32 %v333_v60, 0.0 }
 0x376   :  { %340 = vst [vmem:[#allocation7] sm:$0xff] %v338_v61 }
 0x379   :  { %v335_v62 = vpop.f32.mrf.mxu3 }
 0x37a   :  { %v336_v63 = vadd.f32 %v402_v58, %v335_v62 }
 0x37c   :  { %v339_v0 = vmax.f32 %v336_v63, 0.0 }
 0x37e   :  { %341 = vst [vmem:[#allocation7 + $0x8] sm:$0xff] %v339_v0 }
 0x37f   :  { %354 = dma.vmem_to_hbm [thread:$0]  %s347_s23, 256, %s349_s26, [#allocation4], %s482_s29, %s482_s29, %s483_s30  }
 0x380   :  { %479 = dma.done.wait [#allocation4], 256  }
 0x381   :  { %480 = vsyncadd [#allocation4], 4294967040 }
 0x382   :  { %359 = vsyncpa [#allocation3], 1 }
 0x383   :  { %360 = vsyncpa [#allocation6], 1 }
 0x384   :  { %361 = vsyncpa [#allocation4], 1 }

</bundles_post_ra>
